<compile_context>
chip_gen: v7x
topology: tpu7x:2x2x1
jax: 0.10.0
libtpu: 0.0.40
codegen_flags: <defaults>
</compile_context>

<pallas_src>
import jax
import jax.numpy as jnp
from jax.experimental import pallas as pl
from jax.experimental.pallas import tpu as pltpu


def biaffine_kernel(x_ref, y_ref, u_ref, urow_ref, ucol_ref, c_ref,
                    o_ref, xu_ref, bxc_ref):
    # x_ref: (Bt, tLx, Dp)  y_ref: (Bt, tLy, Dp)  u_ref: (Dp, Dp)
    # urow_ref/ucol_ref: (1, Dp)  c_ref: (1,) in SMEM
    # o_ref: (Bt, tLx, tLy)
    # xu_ref: (Bt, tLx, Dp) scratch (compute dtype)  bxc_ref: (Bt, tLx, 1) f32
    bt, tlx, d = x_ref.shape

    # ---- per-(b, i) work: only on the first Ly tile, reused across all j ----
    @pl.when(pl.program_id(2) == 0)
    def _():
        x = x_ref[...]
        x2 = x.reshape(bt * tlx, d)
        # MXU pass 1: (Bt*tLx, Dp) @ (Dp, Dp), f32 accumulation.
        xu = jnp.dot(x2, u_ref[...], preferred_element_type=jnp.float32)
        xu = xu + urow_ref[...].astype(jnp.float32)            # bias_x row
        xu_ref[...] = xu.reshape(bt, tlx, d).astype(xu_ref.dtype)
        # bias_y term + constant c folded into one per-row bias.
        bx = jnp.sum((x * ucol_ref[...]).astype(jnp.float32),
                     axis=-1, keepdims=True)                    # (Bt, tLx, 1)
        bxc_ref[...] = bx + c_ref[0]

    # ---- MXU pass 2: batched contraction over the shared feature dim -------
    # out[b, lx, ly] = sum_d xu[b, lx, d] * y[b, ly, d]  (no in-kernel transpose)
    out = jax.lax.dot_general(
        xu_ref[...], y_ref[...],
        dimension_numbers=(((2,), (2,)), ((0,), (0,))),
        preferred_element_type=jnp.float32)                     # (Bt, tLx, tLy)
    o_ref[...] = (out + bxc_ref[...]).astype(o_ref.dtype)


def biaffine_forward(x, y, U, bias_x=True, bias_y=True, *,
                     compute_dtype=jnp.bfloat16, out_dtype=jnp.float32,
                     block_lx=512, block_ly=512, tile_budget_bytes=None):
    """x: (B, Lx, in_size), y: (B, Ly, in_size), U: (in_size+bx, 1, in_size+by).

    Returns (B, Lx, Ly, 1), matching the PyTorch module's einsum output.
    """
    B, Lx, D = x.shape
    By, Ly, Dy_in = y.shape
    assert By == B and Dy_in == D, (x.shape, y.shape)
    Dx_tot, one, Dy_tot = U.shape
    assert one == 1 and Dx_tot == D + int(bias_x) and Dy_tot == D + int(bias_y)

    cdt = jnp.dtype(compute_dtype)
    odt = jnp.dtype(out_dtype)

    # --- VMEM budget keyed off the actual chip (v7x: 64 MiB / TC) -----------
    try:
        vmem_cap = int(pltpu.get_tpu_info().vmem_capacity_bytes)
    except Exception:
        vmem_cap = 64 * 1024 * 1024
    vmem_limit = int(vmem_cap * 3 // 4)            # 48 MiB v7x, 96 MiB v5e/v6e
    if tile_budget_bytes is None:
        tile_budget_bytes = max(8 * 1024 * 1024, vmem_cap // 5)

    # --- algebraic bias decomposition (contraction dim stays D, no +1) ------
    u_core = U[:D, 0, :D].astype(cdt)                                 # (D, D)
    u_row = (U[D, 0, :D] if bias_x else jnp.zeros((D,), U.dtype))     # hits y
    u_col = (U[:D, 0, D] if bias_y else jnp.zeros((D,), U.dtype))     # hits x
    c_val = (U[D, 0, D] if (bias_x and bias_y) else jnp.zeros((), U.dtype))
    u_row = u_row.reshape(1, D).astype(cdt)
    u_col = u_col.reshape(1, D).astype(cdt)
    c_arr = jnp.reshape(c_val, (1,)).astype(jnp.float32)              # SMEM

    x_c = x.astype(cdt)
    y_c = y.astype(cdt)

    # --- zero-pad the feature dim to a lane multiple (exact; pads are zero) -
    Dp = max(128, ((D + 127) // 128) * 128)
    if Dp != D:
        pad = Dp - D
        x_c = jnp.pad(x_c, ((0, 0), (0, 0), (0, pad)))
        y_c = jnp.pad(y_c, ((0, 0), (0, 0), (0, pad)))
        u_core = jnp.pad(u_core, ((0, pad), (0, pad)))
        u_row = jnp.pad(u_row, ((0, 0), (0, pad)))
        u_col = jnp.pad(u_col, ((0, 0), (0, pad)))

    # --- tiling: honest per-batch VMEM footprint (double buffers + temps) ---
    tLx = Lx if Lx <= block_lx else block_lx          # multiple of 8 when tiled
    tLy = Ly if Ly <= block_ly else block_ly          # multiple of 128 when tiled
    itm_in = cdt.itemsize
    itm_out = odt.itemsize

    def per_batch_bytes(tlx, tly):
        return (2 * tlx * Dp * itm_in           # x block (double-buffered)
                + 2 * tly * Dp * itm_in         # y block (double-buffered)
                + 2 * tlx * tly * itm_out       # out block (double-buffered)
                + tlx * Dp * itm_in             # xu scratch
                + tlx * 128 * 4                 # bxc scratch (lane-padded)
                + tlx * tly * 4                 # f32 pass-2 temporary
                + tlx * Dp * 4)                 # f32 pass-1 temporary

    u_bytes = 2 * (Dp * Dp + 2 * Dp) * itm_in   # double-buffered U blocks
    budget = max(tile_budget_bytes - u_bytes, per_batch_bytes(tLx, tLy))
    Bt = int(max(1, min(B, budget // per_batch_bytes(tLx, tLy))))

    # Keep a few *parallel* grid steps so both v7x TensorCores get work.
    def n_parallel(bt, tlx):
        return pl.cdiv(B, bt) * pl.cdiv(Lx, tlx)

    while n_parallel(Bt, tLx) < 4:
        if Bt > 1:
            Bt = (Bt + 1) // 2
        elif tLx > 128 and (tLx // 2) % 8 == 0:
            tLx //= 2
        else:
            break

    grid = (pl.cdiv(B, Bt), pl.cdiv(Lx, tLx), pl.cdiv(Ly, tLy))

    flops = int(2 * B * Lx * Dp * Dp + 2 * B * Lx * Ly * Dp + 2 * B * Lx * Dp)
    bytes_accessed = int((B * Lx * Dp + grid[1] * B * Ly * Dp + Dp * Dp) * itm_in
                         + B * Lx * Ly * itm_out)

    out = pl.pallas_call(
        biaffine_kernel,
        out_shape=jax.ShapeDtypeStruct((B, Lx, Ly), odt),
        grid_spec=pltpu.PrefetchScalarGridSpec(
            num_scalar_prefetch=0,
            grid=grid,
            in_specs=[
                pl.BlockSpec((Bt, tLx, Dp), lambda b, i, j: (b, i, 0)),  # x
                pl.BlockSpec((Bt, tLy, Dp), lambda b, i, j: (b, j, 0)),  # y
                pl.BlockSpec((Dp, Dp), lambda b, i, j: (0, 0)),          # U_core
                pl.BlockSpec((1, Dp), lambda b, i, j: (0, 0)),           # u_row
                pl.BlockSpec((1, Dp), lambda b, i, j: (0, 0)),           # u_col
                pl.BlockSpec(memory_space=pltpu.MemorySpace.SMEM),       # c
            ],
            out_specs=pl.BlockSpec((Bt, tLx, tLy), lambda b, i, j: (b, i, j)),
            scratch_shapes=[
                pltpu.VMEM((Bt, tLx, Dp), cdt),          # hoisted x@U + u_row
                pltpu.VMEM((Bt, tLx, 1), jnp.float32),   # hoisted x.u_col + c
            ],
        ),
        compiler_params=pltpu.CompilerParams(
            dimension_semantics=("parallel", "parallel", "arbitrary"),
            vmem_limit_bytes=vmem_limit,
        ),
        cost_estimate=pl.CostEstimate(
            flops=flops, transcendentals=0, bytes_accessed=bytes_accessed),
    )(x_c, y_c, u_core, u_row, u_col, c_arr)

    return out[..., None]                                # (B, Lx, Ly, 1)


if __name__ == "__main__":
    # Small deterministic example consistent with the module's forward:
    # batch=2, seq=8, in_size=32, bias_x=bias_y=True.
    B, L, in_size = 2, 8, 32
    key = jax.random.PRNGKey(0)
    kx, ky, ku = jax.random.split(key, 3)

    x = jax.random.normal(kx, (B, L, in_size), dtype=jnp.float32)
    y = jax.random.normal(ky, (B, L, in_size), dtype=jnp.float32)
    U = jax.random.normal(ku, (in_size + 1, 1, in_size + 1), dtype=jnp.float32)

    # Plain-JAX reference (same semantics as torch.einsum with bias concat).
    xb = jnp.concatenate([x, jnp.ones_like(x[..., :1])], axis=-1)
    yb = jnp.concatenate([y, jnp.ones_like(y[..., :1])], axis=-1)
    ref = jnp.einsum('bxi,ioj,byj->bxyo', xb, U, yb)

    # Full-precision path: tight check.
    out_f32 = biaffine_forward(x, y, U, bias_x=True, bias_y=True,
                               compute_dtype=jnp.float32)
    out_f32 = jax.block_until_ready(out_f32)
    assert out_f32.shape == (B, L, L, 1), out_f32.shape
    err_f32 = float(jnp.max(jnp.abs(out_f32 - ref)))
    assert jnp.allclose(out_f32, ref, atol=2e-3, rtol=2e-3), err_f32

    # Default fast path (bf16 MXU compute, f32 accumulation/output): loose check.
    out_fast = biaffine_forward(x, y, U, bias_x=True, bias_y=True)
    out_fast = jax.block_until_ready(out_fast)
    err_fast = float(jnp.max(jnp.abs(out_fast - ref)))
    assert jnp.allclose(out_fast, ref, atol=1.5, rtol=5e-2), err_fast

    print("KERNEL_OK")
</pallas_src>

<mosaic_0001>
module attributes {stable_mosaic.version = 11 : i64} {
  func.func @biaffine_kernel(%arg0: i32, %arg1: i32, %arg2: i32, %arg3: memref<1x8x128xf32, #tpu.memory_space<vmem>>, %arg4: memref<1x8x128xf32, #tpu.memory_space<vmem>>, %arg5: memref<128x128xf32, #tpu.memory_space<vmem>>, %arg6: memref<1x128xf32, #tpu.memory_space<vmem>>, %arg7: memref<1x128xf32, #tpu.memory_space<vmem>>, %arg8: memref<1xf32, #tpu.memory_space<smem>>, %arg9: memref<1x8x8xf32, #tpu.memory_space<vmem>>, %arg10: memref<1x8x128xf32, #tpu.memory_space<vmem>>, %arg11: memref<1x8x1xf32, #tpu.memory_space<vmem>>) attributes {dimension_semantics = [#tpu.dimension_semantics<parallel>, #tpu.dimension_semantics<parallel>, #tpu.dimension_semantics<arbitrary>], iteration_bounds = array<i64: 2, 1, 1>, scalar_prefetch = 0 : i64, scratch_operands = 2 : i64, tpu.core_type = #tpu.core_type<tc>, window_params = [{transform_indices = @transform_0, window_bounds = array<i64: 1, 8, 128>}, {transform_indices = @transform_1, window_bounds = array<i64: 1, 8, 128>}, {pipeline_mode = #tpu.pipeline_mode<synchronous>, transform_indices = @transform_2, window_bounds = array<i64: 128, 128>}, {pipeline_mode = #tpu.pipeline_mode<synchronous>, transform_indices = @transform_3, window_bounds = array<i64: 1, 128>}, {pipeline_mode = #tpu.pipeline_mode<synchronous>, transform_indices = @transform_4, window_bounds = array<i64: 1, 128>}, {transform_indices = @transform_5, window_bounds = array<i64: 1>}, {transform_indices = @transform_6, window_bounds = array<i64: 1, 8, 8>}]} {
    %c0_i32 = arith.constant 0 : i32
    %0 = arith.cmpi eq, %arg2, %c0_i32 : i32
    %1 = arith.extui %0 : i1 to i32
    %c0_i32_0 = arith.constant 0 : i32
    %2 = arith.cmpi ne, %1, %c0_i32_0 : i32
    scf.if %2 {
      %c0_12 = arith.constant 0 : index
      %c0_13 = arith.constant 0 : index
      %c0_14 = arith.constant 0 : index
      %10 = vector.load %arg3[%c0_12, %c0_13, %c0_14] : memref<1x8x128xf32, #tpu.memory_space<vmem>>, vector<1x8x128xf32>
      %11 = vector.shape_cast %10 : vector<1x8x128xf32> to vector<8x128xf32>
      %c0_15 = arith.constant 0 : index
      %c0_16 = arith.constant 0 : index
      %12 = vector.load %arg5[%c0_15, %c0_16] : memref<128x128xf32, #tpu.memory_space<vmem>>, vector<128x128xf32>
      %cst_17 = arith.constant dense<0.000000e+00> : vector<8x128xf32>
      %13 = tpu.matmul %11, %12, %cst_17 {dimension_numbers = #tpu.dot_dimension_numbers<[1], [0], [0], [1], [0, 0, 1, 1], [], []>} : vector<8x128xf32>, vector<128x128xf32>, vector<8x128xf32> -> vector<8x128xf32>
      %c0_18 = arith.constant 0 : index
      %c0_19 = arith.constant 0 : index
      %14 = vector.load %arg6[%c0_18, %c0_19] : memref<1x128xf32, #tpu.memory_space<vmem>>, vector<1x128xf32>
      %15 = vector.broadcast %14 : vector<1x128xf32> to vector<8x128xf32>
      %16 = arith.addf %13, %15 : vector<8x128xf32>
      %17 = vector.shape_cast %16 : vector<8x128xf32> to vector<1x8x128xf32>
      %c0_20 = arith.constant 0 : index
      %c0_21 = arith.constant 0 : index
      %c0_22 = arith.constant 0 : index
      %18 = vector.load %arg10[%c0_20, %c0_21, %c0_22] : memref<1x8x128xf32, #tpu.memory_space<vmem>>, vector<1x8x128xf32>
      tpu.vector_store %arg10[%c0_20, %c0_21, %c0_22], %17 {strides = array<i32>} : memref<1x8x128xf32, #tpu.memory_space<vmem>>, vector<1x8x128xf32>,
      %c0_23 = arith.constant 0 : index
      %c0_24 = arith.constant 0 : index
      %19 = vector.load %arg7[%c0_23, %c0_24] : memref<1x128xf32, #tpu.memory_space<vmem>>, vector<1x128xf32>
      %20 = vector.shape_cast %19 : vector<1x128xf32> to vector<1x1x128xf32>
      %21 = vector.broadcast %20 : vector<1x1x128xf32> to vector<1x8x128xf32>
      %22 = arith.mulf %10, %21 : vector<1x8x128xf32>
      %cst_25 = arith.constant dense<0.000000e+00> : vector<1x8xf32>
      %23 = vector.multi_reduction <add>, %22, %cst_25 [2] : vector<1x8x128xf32> to vector<1x8xf32>
      %24 = vector.shape_cast %23 : vector<1x8xf32> to vector<1x8x1xf32>
      %c0_26 = arith.constant 0 : index
      %25 = memref.load %arg8[%c0_26] : memref<1xf32, #tpu.memory_space<smem>>
      %26 = vector.broadcast %25 : f32 to vector<1x8x1xf32>
      %27 = arith.addf %24, %26 : vector<1x8x1xf32>
      %c0_27 = arith.constant 0 : index
      %c0_28 = arith.constant 0 : index
      %c0_29 = arith.constant 0 : index
      %28 = vector.load %arg11[%c0_27, %c0_28, %c0_29] : memref<1x8x1xf32, #tpu.memory_space<vmem>>, vector<1x8x1xf32>
      tpu.vector_store %arg11[%c0_27, %c0_28, %c0_29], %27 {strides = array<i32>} : memref<1x8x1xf32, #tpu.memory_space<vmem>>, vector<1x8x1xf32>,
    } else {
    }
    %c0 = arith.constant 0 : index
    %c0_1 = arith.constant 0 : index
    %c0_2 = arith.constant 0 : index
    %3 = vector.load %arg10[%c0, %c0_1, %c0_2] : memref<1x8x128xf32, #tpu.memory_space<vmem>>, vector<1x8x128xf32>
    %c0_3 = arith.constant 0 : index
    %c0_4 = arith.constant 0 : index
    %c0_5 = arith.constant 0 : index
    %4 = vector.load %arg4[%c0_3, %c0_4, %c0_5] : memref<1x8x128xf32, #tpu.memory_space<vmem>>, vector<1x8x128xf32>
    %cst = arith.constant dense<0.000000e+00> : vector<1x8x8xf32>
    %5 = tpu.matmul %3, %4, %cst {dimension_numbers = #tpu.dot_dimension_numbers<[2], [2], [1], [1], [0, 0, 0, 1, 1, 1], [0], [0]>} : vector<1x8x128xf32>, vector<1x8x128xf32>, vector<1x8x8xf32> -> vector<1x8x8xf32>
    %c0_6 = arith.constant 0 : index
    %c0_7 = arith.constant 0 : index
    %c0_8 = arith.constant 0 : index
    %6 = vector.load %arg11[%c0_6, %c0_7, %c0_8] : memref<1x8x1xf32, #tpu.memory_space<vmem>>, vector<1x8x1xf32>
    %7 = vector.broadcast %6 : vector<1x8x1xf32> to vector<1x8x8xf32>
    %8 = arith.addf %5, %7 : vector<1x8x8xf32>
    %c0_9 = arith.constant 0 : index
    %c0_10 = arith.constant 0 : index
    %c0_11 = arith.constant 0 : index
    %9 = vector.load %arg9[%c0_9, %c0_10, %c0_11] : memref<1x8x8xf32, #tpu.memory_space<vmem>>, vector<1x8x8xf32>
    tpu.vector_store %arg9[%c0_9, %c0_10, %c0_11], %8 {strides = array<i32>} : memref<1x8x8xf32, #tpu.memory_space<vmem>>, vector<1x8x8xf32>,
    return
  }
  func.func @transform_0(%arg0: i32, %arg1: i32, %arg2: i32) -> (i32, i32, i32) {
    %c0_i32 = arith.constant 0 : i32
    %c0_i32_0 = arith.constant 0 : i32
    return %arg0, %arg1, %c0_i32 : i32, i32, i32
  }
  func.func @transform_1(%arg0: i32, %arg1: i32, %arg2: i32) -> (i32, i32, i32) {
    %c0_i32 = arith.constant 0 : i32
    %c0_i32_0 = arith.constant 0 : i32
    return %arg0, %arg2, %c0_i32 : i32, i32, i32
  }
  func.func @transform_2(%arg0: i32, %arg1: i32, %arg2: i32) -> (i32, i32) {
    %c0_i32 = arith.constant 0 : i32
    %c0_i32_0 = arith.constant 0 : i32
    %c0_i32_1 = arith.constant 0 : i32
    return %c0_i32, %c0_i32_0 : i32, i32
  }
  func.func @transform_3(%arg0: i32, %arg1: i32, %arg2: i32) -> (i32, i32) {
    %c0_i32 = arith.constant 0 : i32
    %c0_i32_0 = arith.constant 0 : i32
    %c0_i32_1 = arith.constant 0 : i32
    return %c0_i32, %c0_i32_0 : i32, i32
  }
  func.func @transform_4(%arg0: i32, %arg1: i32, %arg2: i32) -> (i32, i32) {
    %c0_i32 = arith.constant 0 : i32
    %c0_i32_0 = arith.constant 0 : i32
    %c0_i32_1 = arith.constant 0 : i32
    return %c0_i32, %c0_i32_0 : i32, i32
  }
  func.func @transform_5(%arg0: i32, %arg1: i32, %arg2: i32) -> i32 {
    %c0_i32 = arith.constant 0 : i32
    %c0_i32_0 = arith.constant 0 : i32
    return %c0_i32 : i32
  }
  func.func @transform_6(%arg0: i32, %arg1: i32, %arg2: i32) -> (i32, i32, i32) {
    %c0_i32 = arith.constant 0 : i32
    return %arg0, %arg1, %arg2 : i32, i32, i32
  }
}

</mosaic_0001>

<bundles_post_ra>
// kernel: tpu_custom_call.1
= control target key start
LH: loop header
LB: loop body
LE: loop exit
PB: predicated region body
PF: predicated region fallthrough
CT: control target
= control target key end

     0   :  { %s1350_s0 = inlined_call_operand.hbm [shape: f32[2,8,128], index: 0, kind: input, shape index: {}]   ;;  %s1351_s1 = inlined_call_operand.hbm [shape: f32[2,8,128], index: 1, kind: input, shape index: {}]   ;;  %s1352_s2 = inlined_call_operand.hbm [shape: f32[128,128], index: 2, kind: input, shape index: {}]   ;;  %s1353_s3 = inlined_call_operand.vmem [shape: f32[1,128], index: 3, kind: input, shape index: {}]   ;;  %s1354_s4 = inlined_call_operand.vmem [shape: f32[1,128], index: 4, kind: input, shape index: {}]   ;;  %s1355_s5 = inlined_call_operand.<no memory space> [shape: f32[1], index: 5, kind: input, shape index: {}]   ;;  %s1356_s6 = inlined_call_operand.hbm [shape: f32[2,8,8], index: 6, kind: output, shape index: {}]  }
   0x1   :  { %1363 = sst [smem:[#allocation19_spill]] %s1352_s2 }
   0x2   :  { %11 = sst [smem:[#allocation4]] %s1355_s5 }
   0x3   :  { %12 = vsyncpa [#allocation6], 0 }
   0x4   :  { %14 = vsyncpa [#allocation6 + $0x1], 0 }
   0x5   :  { %15 = vsyncpa [#allocation9], 0 }
   0x6   :  { %17 = vsyncpa [#allocation9 + $0x1], 0 }
   0x7   :  { %18 = vsyncpa [#allocation7], 0 }
   0x8   :  { %20 = vsyncpa [#allocation7 + $0x1], 0  ;;  %s1091_s23 = smov 0   ;;  %s1093_s24 = smov 0  }
   0x9   :  { %s1095_s25 = smov 0   ;;  %s1097_s26 = smov 0  }
   0xa   :  { %s1099_s27 = smov 0   ;;  %s1101_s28 = smov 0  }
   0xb LB: > { %1364 = sst [smem:[#allocation16_spill]] %s1037_s27  ;;  %s1122_s5 = sadd.s32 4294967295, %s1041_s28   ;;  %s1041_s28 = sphi %s1101_s28, %s26_s28   ;;  %s1037_s27 = sphi %s1099_s27, %s1385_s27   ;;  %s1033_s26 = sphi %s1097_s26, %s1384_s26   ;;  %s1029_s25 = sphi %s1095_s25, %s1388_s25   ;;  %s1025_s24 = sphi %s1093_s24, %s1387_s24   ;;  %s1021_s23 = sphi %s1091_s23, %s1386_s23  }
   0xc   : > { %s676_s29 = sadd.s32 4294967294, %s1041_s28   ;;  %p67_p0 = scmp.ne.s32.totalorder %s1025_s24, %s1021_s23 }
   0xd   : > { %p1357_p1 = scmp.eq.s32.totalorder %s1122_s5, 0  ;;  %p213_p3 = scmp.eq.s32.totalorder %s676_s29, 1 }
   0xe   : > { %p677_p5 = scmp.ge.s32.totalorder %s1041_s28, 1  ;;  %p220_p7 = scmp.lt.s32.totalorder %s1041_s28, 3 }
   0xf   : > { %p1131_p4 = por %p1357_p1, %p67_p0  ;;  %p1136_p6 = por %p213_p3, %p67_p0 }
  0x10   : > { %p1141_p8 = pnand %p677_p5, %p220_p7  ;;  %s1043_s9 = smov [#allocation10]  }
  0x11   : > { %s1365_s30 = scalar_select %p1131_p4, 1, 0 }
  0x12   : > { %s1366_s7 = scalar_select %p1136_p6, 1, 0 }
  0x13   : > { %s1367_s8 = scalar_select %p1141_p8, 1, 0 }
  0x14   : > { %s232_s10 = sshll.u32 %s1043_s9, 4  ;;  %p788_p9 = pneg %p1141_p8  ;;  %s233_s10 = int_to_ptr.vmem [resolvable:$true] %s232_s10 }
  0x15   : > { %s45_s12 = sadd.s32 1, %s1037_s27  ;;  %s1369_s2 = sld [smem:[#allocation19_spill]] }
  0x16   : > { %p1150_p11 = pnand %p788_p9, %p1357_p1 }
  0x18   : > { %p865_p13 = pneg %p1150_p11 }
  0x1b   : > { %s863_s15 = scalar_lea.hbm %s1369_s2, 2048 }
  0x1c   : > { %p864_p12 = scmp.ne.s32.totalorder %s1369_s2, %s863_s15  ;;  %p870_p5 = scmp.lt.u32.totalorder %s863_s15, %s1369_s2 }
  0x1e   : > { %p866_p0 = pnand %p865_p13, %p864_p12 }
  0x20   : > { %p867_p3 = pneg %p866_p0 }
  0x22   : > { %p872_p7 = pnand %p870_p5, %p867_p3 }
  0x24   : > { %875 = shalt.err (!%p872_p7)
}
  0x25   : > { %s876_s20 = scalar_lea.vmem %s233_s10, 2048  ;;  %p884_p2 = scmp.lt.s32.totalorder %s233_s10, %s233_s10 }
  0x26   : > { %p877_p9 = scmp.ne.s32.totalorder %s233_s10, %s876_s20  ;;  %p885_p6 = scmp.lt.s32.totalorder %s876_s20, %s876_s20 }
  0x28   : > { %p879_p10 = pnand %p877_p9, %p865_p13  ;;  %p886_p4 = por %p885_p6, %p884_p2 }
  0x2a   : > { %p880_p1 = pneg %p879_p10 }
  0x2c   : > { %p887_p8 = pnand %p886_p4, %p880_p1 }
  0x2e   : > { %890 = shalt.err (!%p887_p8)
}
  0x2f   : > { %s1044_s21 = smov 128   ;;  %s1045_s22 = smov 8  }
  0x30   : > { %791 = dma.hbm_to_vmem [thread:$0]  (!%p1150_p11), %s1369_s2, 2048, %s233_s10, [#allocation9], %s1044_s21, %s1044_s21, %s1045_s22  }
  0x31   : > { %p47_p1 = scmp.ge.s32.totalorder %s45_s12, 2  ;;  %s54_s13 = sadd.s32 1, %s1029_s25 }
  0x32   : > { %p61_p2 = scmp.ne.s32.totalorder %s1029_s25, %s1025_s24  ;;  %p62_p4 = scmp.eq.s32.totalorder %s1041_s28, 0 }
  0x33   : > { %s1390_s12 = smov (%p47_p1, %s45_s12), 0  ;;  %p1372_p8 = scmp.eq.s32.totalorder %s1122_s5, 1 }
  0x34   : > { %1370 = sst [smem:[#allocation17_spill]] %s1390_s12  ;;  %p1177_p6 = por %p62_p4, %p61_p2 }
  0x35   : > { %p1183_p10 = por %p1372_p8, %p61_p2  ;;  %s49_s15 = ssub.s32 %s1037_s27, %s1390_s12 }
  0x36   : > { %p804_p11 = scmp.lt.s32.totalorder %s1041_s28, 2  ;;  %p52_p12 = scmp.eq.s32.totalorder %s49_s15, 0 }
  0x37   : > { %s1373_s11 = scalar_select %p1183_p10, 1, 0 }
  0x38   : > { %s255_s10 = sand.u32 1, %s1029_s25   ;;  %s681_s18 = sshll.u32 %s1037_s27, 7 }
  0x39   : > { %s1191_s16 = sshll.u32 %s255_s10, 3  ;;  %s1200_s21 = scalar_lea.hbm %s1350_s0, %s681_s18 }
  0x3a   : > { %s1194_s17 = scalar_select %p52_p12, %s1029_s25, %s54_s13  }
  0x3b   : > { %s259_s22 = scalar_lea.vmem [#allocation5], %s1191_s16  ;;  %p1207_p13 = pnand %p804_p11, %p1177_p6 }
  0x3c   : > { %1374 = sst [smem:[#allocation18_spill]] %s1194_s17  ;;  %s267_s29 = sshll.u32 %s259_s22, 4  ;;  %s1203_s29 = int_to_ptr.vmem [resolvable:$true] %s267_s29 }
  0x3d   : > { %s1214_s19 = scalar_lea.hbm %s1351_s1, %s681_s18  ;;  %s274_s20 = sand.u32 1, %s1041_s28  }
  0x3e   : > { %s256_s2 = scalar_lea.sflag [#allocation6], %s255_s10  ;;  %s891_s12 = scalar_lea.hbm %s1200_s21, 128 }
  0x3f   : > { %p892_p0 = scmp.ne.s32.totalorder %s1200_s21, %s891_s12  ;;  %p893_p3 = pneg %p1207_p13 }
  0x40   : > { %s896_s27 = scalar_lea.hbm %s1350_s0, 256  ;;  %p897_p9 = scmp.lt.u32.totalorder %s1200_s21, %s1350_s0 }
  0x41   : > { %p894_p5 = pnand %p893_p3, %p892_p0  ;;  %p898_p1 = scmp.lt.u32.totalorder %s896_s27, %s891_s12 }
  0x42   : > { %p900_p4 = scmp.lt.u32.totalorder %s891_s12, %s1200_s21 }
  0x43   : > { %p895_p7 = pneg %p894_p5  ;;  %p899_p2 = por %p898_p1, %p897_p9 }
  0x45   : > { %p901_p6 = por %p900_p4, %p899_p2 }
  0x47   : > { %p902_p8 = pnand %p901_p6, %p895_p7 }
  0x49   : > { %905 = shalt.err (!%p902_p8)
}
  0x4a   : > { %s906_s10 = scalar_lea.vmem %s1203_s29, 128  ;;  %s1046_s18 = smov [#allocation5]  }
  0x4b   : > { %p907_p11 = scmp.ne.s32.totalorder %s1203_s29, %s906_s10  ;;  %s911_s15 = sshll.u32 %s1046_s18, 4  ;;  %s912_s15 = int_to_ptr.vmem [resolvable:$false] %s911_s15 }
  0x4c   : > { %s913_s17 = scalar_lea.vmem %s912_s15, 256  ;;  %p914_p5 = scmp.lt.s32.totalorder %s1203_s29, %s912_s15 }
  0x4d   : > { %p909_p12 = pnand %p907_p11, %p893_p3  ;;  %p915_p9 = scmp.lt.s32.totalorder %s913_s17, %s906_s10 }
  0x4f   : > { %p910_p0 = pneg %p909_p12  ;;  %p916_p1 = por %p915_p9, %p914_p5 }
  0x51   : > { %p917_p2 = pnand %p916_p1, %p910_p0 }
  0x53   : > { %920 = shalt.err (!%p917_p2)
}
  0x54   : > { %795 = dma.hbm_to_vmem [thread:$0]  (!%p1207_p13), %s1200_s21, 128, %s1203_s29, %s256_s2  }
  0x55   : > { %s278_s27 = scalar_lea.vmem [#allocation8], %s1191_s16  ;;  %s275_s14 = scalar_lea.sflag [#allocation9], %s274_s20 }
  0x56   : > { %s286_s12 = sshll.u32 %s278_s27, 4  ;;  %s921_s22 = scalar_lea.hbm %s1214_s19, 128  ;;  %s287_s12 = int_to_ptr.vmem [resolvable:$true] %s286_s12 }
  0x57   : > { %p922_p7 = scmp.ne.s32.totalorder %s1214_s19, %s921_s22  ;;  %s926_s18 = scalar_lea.hbm %s1351_s1, 256 }
  0x58   : > { %p927_p8 = scmp.lt.u32.totalorder %s1214_s19, %s1351_s1  ;;  %p928_p11 = scmp.lt.u32.totalorder %s926_s18, %s921_s22 }
  0x59   : > { %p924_p4 = pnand %p922_p7, %p893_p3  ;;  %p930_p0 = scmp.lt.u32.totalorder %s921_s22, %s1214_s19 }
  0x5a   : > { %p929_p12 = por %p928_p11, %p927_p8 }
  0x5b   : > { %p925_p6 = pneg %p924_p4 }
  0x5c   : > { %p931_p5 = por %p930_p0, %p929_p12 }
  0x5e   : > { %p932_p9 = pnand %p931_p5, %p925_p6 }
  0x60   : > { %935 = shalt.err (!%p932_p9)
}
  0x61   : > { %s936_s2 = scalar_lea.vmem %s287_s12, 128  ;;  %s1047_s16 = smov [#allocation8]  }
  0x62   : > { %p937_p1 = scmp.ne.s32.totalorder %s287_s12, %s936_s2  ;;  %s941_s21 = sshll.u32 %s1047_s16, 4  ;;  %s942_s21 = int_to_ptr.vmem [resolvable:$false] %s941_s21 }
  0x63   : > { %s943_s29 = scalar_lea.vmem %s942_s21, 256  ;;  %p944_p4 = scmp.lt.s32.totalorder %s287_s12, %s942_s21 }
  0x64   : > { %p939_p2 = pnand %p937_p1, %p893_p3  ;;  %p945_p10 = scmp.lt.s32.totalorder %s943_s29, %s936_s2 }
  0x66   : > { %p940_p7 = pneg %p939_p2  ;;  %p946_p8 = por %p945_p10, %p944_p4 }
  0x68   : > { %p947_p11 = pnand %p946_p8, %p940_p7 }
  0x6a   : > { %950 = shalt.err (!%p947_p11)
}
  0x6b   : > { %798 = dma.hbm_to_vmem [thread:$0]  (!%p1207_p13), %s1214_s19, 128, %s287_s12, %s275_s14  }
  0x6c   : > { %p1376_p6 = scmp.ne.s32.totalorder %s1367_s8, 0 }
  0x6d   : > { %s1267_s20 = sand.u32 (!%p1376_p6), 1, %s1025_s24   ;;  %p1377_p10 = scmp.ne.s32.totalorder (!%p1376_p6), %s1365_s30, 0 }
  0x6e   : > { %295 = sbr.rel (%p1376_p6) target bundleno = 600 (0x258), region = 44  ;;  %s1270_s27 = sshll.u32 (!%p1376_p6), %s1267_s20, 3 }
  0x6f   : > { %s298_s22 = scalar_lea.sflag (!%p1376_p6), [#allocation6], %s1267_s20  ;;  %s301_s13 = scalar_lea.vmem (!%p1376_p6), [#allocation5], %s1270_s27 }
  0x75   : > { %1004 = dma.done.wait (%p1377_p10), %s298_s22, 128  }
  0x76   : > { %1006 = vsyncadd (%p1377_p10), %s298_s22, 4294967168  ;;  %s306_s8 = sand.u32 1, %s1122_s5   ;;  %s310_s19 = scalar_lea.vmem [#allocation8], %s1270_s27 }
  0x77   : > { %s307_s9 = scalar_lea.sflag [#allocation9], %s306_s8 }
  0x78   : > { %1008 = dma.done.wait (%p1377_p10), %s307_s9, 128  }
  0x79   : > { %1010 = vsyncadd (%p1377_p10), %s307_s9, 4294967168  ;;  %p1378_p13 = scmp.eq.s32.totalorder %s1122_s5, 0 }
  0x7b   : > { %1012 = dma.done.wait (%p1378_p13), [#allocation9], 2048   ;;  %p1379_p3 = pmov %p1378_p13 }
  0x7c   : > { %v1048_v0 = vmov 0.0|0.0   ;;  %vm1049_vm0 = vmmov 0   ;;  %v1050_v1 = vmov 0.0   ;;  %v353_v2 = vld [vmem:[#allocation10] sm:$0xff]  ;;  %v354_v3 = vld [vmem:[#allocation10 + $0x8] sm:$0xff]  ;;  %v355_v4 = vld [vmem:[#allocation10 + $0x10] sm:$0xff] }
  0x7d   : > { %1014 = vsyncadd (%p1379_p3), [#allocation9], 4294965248  ;;  %754 = vmatprep.subr.bf16.mxu0 %v1048_v0  ;;  %746 = vmatprep.mubr.msk.f32.mxu0 %vm1049_vm0, %v1050_v1  ;;  %v755_v5 = vpack.c.bf16 %v354_v3, %v353_v2  ;;  %v356_v6 = vld [vmem:[#allocation10 + $0x18] sm:$0xff]  ;;  %v357_v8 = vld [vmem:[#allocation10 + $0x20] sm:$0xff]  ;;  %v1051_v30 = vmov 0   ;;  %s457_s12 = sld [smem:[#allocation4]] }
  0x7e   : > { %749 = vmatprep.subr.mxu1 %v1050_v1  ;;  %751 = vmatprep.mubr.msk.f32.mxu1 %vm1049_vm0, %v1050_v1  ;;  %v758_v7 = vpack.c.bf16 %v356_v6, %v355_v4  ;;  %v358_v9 = vld [vmem:[#allocation10 + $0x28] sm:$0xff]  ;;  %v690_v11 = vld [vmem:[%s1354_s4] ss:$0 sm:$0xff]  ;;  %v359_v14 = vld [vmem:[#allocation10 + $0x30] sm:$0xff]  ;;  %vm460_vm1 = vcmask 7168   ;;  %s692_s18 = sshll.u32 %s1033_s26, 7 }
  0x7f   : > { %756 = vmatpush3.bf16.msra.mxu0 %v755_v5  ;;  %v352_v10 = vld [vmem:[%s301_s13] sm:$0xff]  ;;  %v761_v13 = vpack.c.bf16 %v358_v9, %v357_v8  ;;  %v360_v15 = vld [vmem:[#allocation10 + $0x38] sm:$0xff]  ;;  %v363_v20 = vld [vmem:[#allocation10 + $0x50] sm:$0xff]  ;;  %862 = vset.pattern.permute.xlu0 %v1051_v30  ;;  %s347_s15 = scalar_lea.vmem [#allocation11], %s1270_s27  ;;  %vm540_vm2 = vcmask 64512   ;;  %s1301_s21 = scalar_lea.hbm %s1356_s6, %s692_s18 }
  0x80   : > { %757 = vmatprep.subr.bf16.mxu0 %v1048_v0  ;;  %v454_v12 = vmul.f32 %v690_v11, %v352_v10  ;;  %v764_v16 = vpack.c.bf16 %v360_v15, %v359_v14  ;;  %v361_v17 = vld [vmem:[#allocation10 + $0x40] sm:$0xff]  ;;  %v362_v18 = vld [vmem:[#allocation10 + $0x48] sm:$0xff]  ;;  %v364_v21 = vld [vmem:[#allocation10 + $0x58] sm:$0xff]  ;;  %s558_s17 = sshll.u32 %s347_s15, 4  ;;  %s543_s29 = scalar_lea.sflag [#allocation7], %s1267_s20  ;;  %s1303_s17 = int_to_ptr.vmem [resolvable:$true] %s558_s17 }
  0x81   : > { %v767_v19 = vpack.c.bf16 %v362_v18, %v361_v17  ;;  %v770_v22 = vpack.c.bf16 %v364_v21, %v363_v20  ;;  %v365_v23 = vld [vmem:[#allocation10 + $0x60] sm:$0xff]  ;;  %v366_v24 = vld [vmem:[#allocation10 + $0x68] sm:$0xff]  ;;  %v367_v26 = vld [vmem:[#allocation10 + $0x70] sm:$0xff]  ;;  %s951_s22 = scalar_lea.vmem %s1303_s17, 128  ;;  %p1380_p0 = scmp.ne.s32.totalorder %s1373_s11, 0 }
  0x82   : > { %455 = vadd.xlane.f32.xlu0 %v454_v12  ;;  %v773_v25 = vpack.c.bf16 %v366_v24, %v365_v23  ;;  %v368_v27 = vld [vmem:[#allocation10 + $0x78] sm:$0xff]  ;;  %p952_p12 = scmp.ne.s32.totalorder %s1303_s17, %s951_s22  ;;  %s1052_s26 = smov [#allocation11]  }
  0x83   : > { %759 = vmatpush3.bf16.msra.mxu0 %v758_v7  ;;  %v776_v28 = vpack.c.bf16 %v368_v27, %v367_v26  ;;  %v463_v29 = vld [vmem:[%s310_s19] sm:$0xff]  ;;  %v458_v31 = vstv %s457_s12  ;;  %s955_s27 = sshll.u32 %s1052_s26, 4  ;;  %s956_s27 = int_to_ptr.vmem [resolvable:$false] %s955_s27 }
  0x84   : > { %760 = vmatprep.subr.bf16.mxu0 %v1048_v0  ;;  %750 = vmatpush3.xpose.msra.mxu1 %v463_v29  ;;  %v689_v35 = vld [vmem:[%s1353_s3] ss:$0 sm:$0xff]  ;;  %p953_p5 = pnand %p952_p12, %p1380_p0  ;;  %s957_s13 = scalar_lea.vmem %s956_s27, 256 }
  0x85   : > { %p958_p1 = scmp.lt.s32.totalorder %s1303_s17, %s956_s27  ;;  %p959_p2 = scmp.lt.s32.totalorder %s957_s13, %s951_s22 }
  0x86   : > { %p954_p9 = pneg %p953_p5 }
  0x87   : > { %762 = vmatpush3.bf16.msra.mxu0 %v761_v13  ;;  %p960_p7 = por %p959_p2, %p958_p1 }
  0x88   : > { %763 = vmatprep.subr.bf16.mxu0 %v1048_v0 }
  0x89   : > { %p961_p4 = pnand %p960_p7, %p954_p9 }
  0x8b   : > { %765 = vmatpush3.bf16.msra.mxu0 %v764_v16 }
  0x8c   : > { %766 = vmatprep.subr.bf16.mxu0 %v1048_v0 }
  0x8f   : > { %768 = vmatpush3.bf16.msra.mxu0 %v767_v19 }
  0x90   : > { %769 = vmatprep.subr.bf16.mxu0 %v1048_v0 }
  0x93   : > { %771 = vmatpush3.bf16.msra.mxu0 %v770_v22 }
  0x94   : > { %772 = vmatprep.subr.bf16.mxu0 %v1048_v0 }
  0x97   : > { %774 = vmatpush3.bf16.msra.mxu0 %v773_v25 }
  0x98   : > { %775 = vmatprep.subr.bf16.mxu0 %v1048_v0 }
  0x9b   : > { %777 = vmatpush3.bf16.msra.mxu0 %v776_v28 }
  0x9e   : > { %747 = vmatmul.mubr.f32.vlgmr.msra.gmra.mrb[0].mxu0 %v352_v10 }
 0x10f   : > { %v456_v32 = vpop.xlane.xlu0 %455 }
 0x110   : > { %v459_v33 = vadd.f32 %v458_v31, %v456_v32 }
 0x112   : > { %461 = vst.msk [vmem:[#allocation3] sm:$0xff] %vm460_vm1, %v459_v33 }
 0x119   : > { %v464_v34 = vld [vmem:[#allocation3] sm:$0xff] }
 0x11a   : > { %467 = vperm.xlu0 %862, %v464_v34  }
 0x171   : > { %v442_v36 = vpop.f32.mrb[0].mxu0 }
 0x172   : > { %v443_v37 = vadd.f32 %v689_v35, %v442_v36  ;;  %v748_v38 = vpop.f32.mrb[1].mxu0 }
 0x174   : > { %752 = vmatmul.mubr.f32.vlgmr.msra.gmra.mrb[0].mxu1 %v443_v37 }
 0x199   : > { %v468_v39 = vpop.permute.xlu0 %467 }
 0x247   : > { %v536_v40 = vpop.f32.mrb[0].mxu1 }
 0x248   : > { %v537_v41 = vadd.f32 %v536_v40, %v468_v39  ;;  %v753_v42 = vpop.f32.mrb[1].mxu1 }
 0x24a   : > { %541 = vst.msk [vmem:[%s347_s15] sm:$0xff] %vm540_vm2, %v537_v41 }
 0x24b   : > { %964 = shalt.err (!%p961_p4)
}
 0x24c   : > { %s965_s20 = scalar_lea.hbm %s1301_s21, 128  ;;  %s969_s19 = scalar_lea.hbm %s1356_s6, 256 }
 0x24d   : > { %p966_p8 = scmp.ne.s32.totalorder %s1301_s21, %s965_s20  ;;  %p970_p10 = scmp.lt.u32.totalorder %s1301_s21, %s1356_s6 }
 0x24e   : > { %p971_p13 = scmp.lt.u32.totalorder %s969_s19, %s965_s20  ;;  %p973_p12 = scmp.lt.u32.totalorder %s965_s20, %s1301_s21 }
 0x24f   : > { %p967_p11 = pnand %p966_p8, %p1380_p0 }
 0x250   : > { %p972_p3 = por %p971_p13, %p970_p10 }
 0x251   : > { %p968_p6 = pneg %p967_p11 }
 0x252   : > { %p974_p5 = por %p973_p12, %p972_p3 }
 0x254   : > { %p975_p9 = pnand %p974_p5, %p968_p6 }
 0x256   : > { %978 = shalt.err (!%p975_p9)
}
 0x257   : > { %786 = dma.vmem_to_hbm [thread:$0]  (%p1380_p0), %s1303_s17, 128, %s1301_s21, %s543_s29  }
 0x258 PF: > { %s570_s12 = sand.u32 1, %s1021_s23   ;;  %p1381_p1 = scmp.ne.s32.totalorder %s1366_s7, 0 }
 0x259   : > { %p1382_p2 = scmp.ge.s32.totalorder %s1041_s28, 2  ;;  %s571_s14 = scalar_lea.sflag [#allocation7], %s570_s12 }
 0x25b   : > { %p800_p7 = pnand %p1382_p2, %p1381_p1 }
 0x25d   : > { %1016 = dma.done.wait (!%p800_p7), %s571_s14, 128  }
 0x25e   : > { %1018 = vsyncadd (!%p800_p7), %s571_s14, 4294967168  ;;  %s26_s28 = sadd.s32 1, %s1041_s28   ;;  %s1383_s11 = sld [smem:[#allocation18_spill]] }
 0x25f   : > { %p23_p4 = scmp.ge.s32.totalorder %s26_s28, 4   ;;  %s1384_s26 = sld [smem:[#allocation16_spill]] }
 0x260   : > { %s1385_s27 = sld [smem:[#allocation17_spill]]  ;;  %s1386_s23 = smov %s1025_s24 }
 0x261   : > { %s1387_s24 = smov %s1029_s25  ;;  %25 = sbr.rel (!%p23_p4) target bundleno = 11 (0xb), region = 110 }
 0x264   : > { %s1388_s25 = smov %s1383_s11 }
 0x268   :  { %576 = vsyncpa [#allocation6], 1 }
 0x269   :  { %578 = vsyncpa [#allocation6 + $0x1], 1 }
 0x26a   :  { %579 = vsyncpa [#allocation9], 1 }
 0x26b   :  { %581 = vsyncpa [#allocation9 + $0x1], 1 }
 0x26c   :  { %582 = vsyncpa [#allocation7], 1 }
 0x26d   :  { %584 = vsyncpa [#allocation7 + $0x1], 1 }

</bundles_post_ra>
